<compile_context>
chip_gen: v7x
topology: tpu7x:2x2x1
jax: 0.10.0
libtpu: 0.0.40
codegen_flags: <defaults>
</compile_context>

<pallas_src>
import jax
import jax.numpy as jnp
from jax.experimental import pallas as pl
from jax.experimental.pallas import tpu as pltpu


def _round_up(a: int, b: int) -> int:
    return (a + b - 1) // b * b


def _mlp_kernel(xT_ref, w1_ref, b1_ref, w2_ref, b2_ref, o_ref):
    # xT:(3,TM)  w1:(32,3)  b1:(32,1)  w2:(32,1)  b2:(1,1)  o:(1,TM)
    #
    # Layer 1 on the MXU (frees the saturated VALU slot; K=3 is tiny but the
    # vector-extended slot is otherwise idle).
    h = jnp.dot(
        w1_ref[...], xT_ref[...],
        preferred_element_type=jnp.float32,
        precision=jax.lax.Precision.HIGHEST,
    )                                                        # (32, TM)
    h = jnp.maximum(h + b1_ref[...], 0.0)                    # bias + ReLU on VPU

    # Layer 2: per-column weighted 32-wide sublane reduce (VPU multiply + XLU
    # cross-sublane reduce), then bias.
    o = jnp.sum(h * w2_ref[...], axis=0, keepdims=True) + b2_ref[...]   # (1, TM)
    o_ref[...] = o.astype(o_ref.dtype)


def _compute_tile(n: int, block_rows: int) -> int:
    """Lane-tile size. Multiple of 128 (or full extent for tiny batches)."""
    if n <= 128:
        return n  # full-extent block: satisfies the (8,128) rule via "equals full dim"
    tm = min(_round_up(block_rows, 128), _round_up(n, 128))
    # Guarantee >= ~4 grid steps on large batches so ("parallel",) can shard
    # the batch across both TensorCores on v7x.
    tm = min(tm, max(128, _round_up(-(-n // 4), 128)))
    return tm


def pe_model_forward_feature_major(xT, w1, b1, w2, b2, *, block_rows: int = 32768):
    """Fast path: x already in feature-major layout.

    xT: (3, N) float32   ->  returns (1, N) float32
    """
    n = xT.shape[1]
    tm = _compute_tile(n, block_rows)
    grid = (pl.cdiv(n, tm),)   # no padding pass: Pallas masks the partial tail block

    w1c = w1.astype(jnp.float32)                    # (32, 3)
    b1c = b1.reshape(32, 1).astype(jnp.float32)     # (32, 1)
    w2c = w2.reshape(1, 32).T.astype(jnp.float32)   # (32, 1)
    b2c = b2.reshape(1, 1).astype(jnp.float32)      # (1, 1)

    const = lambda shape: pl.BlockSpec(shape, lambda i: (0, 0))

    return pl.pallas_call(
        _mlp_kernel,
        out_shape=jax.ShapeDtypeStruct((1, n), jnp.float32),
        grid=grid,
        in_specs=[
            pl.BlockSpec((3, tm), lambda i: (0, i)),   # x tiles stream along batch
            const((32, 3)),                            # weights: VMEM-resident
            const((32, 1)),
            const((32, 1)),
            const((1, 1)),
        ],
        out_specs=pl.BlockSpec((1, tm), lambda i: (0, i)),   # lane-dense output slab
        compiler_params=pltpu.CompilerParams(
            dimension_semantics=("parallel",),     # shard batch across TCs (v7x)
            vmem_limit_bytes=48 * 1024 * 1024,     # fits v7x's 64 MiB physical VMEM
        ),
    )(xT, w1c, b1c, w2c, b2c)


def pe_model_forward(x, w1, b1, w2, b2, *, block_rows: int = 32768):
    """PyTorch-layout entry point: x (N, 3) -> (N, 1).

    Pays one small XLA transpose to feature-major (no pad pass); producers that
    can emit (3, N) directly should call pe_model_forward_feature_major.
    """
    n = x.shape[0]
    out = pe_model_forward_feature_major(
        x.T.astype(jnp.float32), w1, b1, w2, b2, block_rows=block_rows)
    return out.reshape(n, 1)


def init_params(key):
    """nn.Linear-style U(-1/sqrt(fan_in), 1/sqrt(fan_in)) init, PyTorch layout."""
    k1, k2, k3, k4 = jax.random.split(key, 4)
    bound1 = 1.0 / jnp.sqrt(3.0)
    bound2 = 1.0 / jnp.sqrt(32.0)
    w1 = jax.random.uniform(k1, (32, 3), jnp.float32, -bound1, bound1)
    b1 = jax.random.uniform(k2, (32,), jnp.float32, -bound1, bound1)
    w2 = jax.random.uniform(k3, (1, 32), jnp.float32, -bound2, bound2)
    b2 = jax.random.uniform(k4, (1,), jnp.float32, -bound2, bound2)
    return w1, b1, w2, b2


if __name__ == "__main__":
    key = jax.random.PRNGKey(0)
    k_param, k_x1, k_x2 = jax.random.split(key, 3)
    w1, b1, w2, b2 = init_params(k_param)

    hp = jax.lax.Precision.HIGHEST

    def ref_forward(x):
        h = jnp.maximum(jnp.dot(x, w1.T, precision=hp) + b1[None, :], 0.0)
        return jnp.dot(h, w2.T, precision=hp) + b2[None, :]

    # Small batch matching PEModel.forward: (N, 3) -> (N, 1).
    x_small = jax.random.normal(k_x1, (8, 3), jnp.float32)
    out_small = jax.block_until_ready(pe_model_forward(x_small, w1, b1, w2, b2))
    assert out_small.shape == (8, 1)
    assert jnp.allclose(out_small, ref_forward(x_small), atol=1e-4, rtol=1e-4), \
        "mismatch (N=8)"

    # Multi-step grid + partial trailing block (1000 % 256 != 0), no padding pass.
    x_big = jax.random.normal(k_x2, (1000, 3), jnp.float32)
    out_big = jax.block_until_ready(
        pe_model_forward(x_big, w1, b1, w2, b2, block_rows=256))
    assert out_big.shape == (1000, 1)
    assert jnp.allclose(out_big, ref_forward(x_big), atol=1e-4, rtol=1e-4), \
        "mismatch (N=1000)"

    print("KERNEL_OK")
</pallas_src>

<mosaic_0001>
module attributes {stable_mosaic.version = 11 : i64} {
  func.func @_mlp_kernel(%arg0: i32, %arg1: memref<3x8xf32, #tpu.memory_space<vmem>>, %arg2: memref<32x3xf32, #tpu.memory_space<vmem>>, %arg3: memref<32x1xf32, #tpu.memory_space<vmem>>, %arg4: memref<32x1xf32, #tpu.memory_space<vmem>>, %arg5: memref<1x1xf32, #tpu.memory_space<vmem>>, %arg6: memref<1x8xf32, #tpu.memory_space<vmem>>) attributes {dimension_semantics = [#tpu.dimension_semantics<parallel>], iteration_bounds = array<i64: 1>, scalar_prefetch = 0 : i64, scratch_operands = 0 : i64, tpu.core_type = #tpu.core_type<tc>, window_params = [{transform_indices = @transform_0, window_bounds = array<i64: 3, 8>}, {pipeline_mode = #tpu.pipeline_mode<synchronous>, transform_indices = @transform_1, window_bounds = array<i64: 32, 3>}, {pipeline_mode = #tpu.pipeline_mode<synchronous>, transform_indices = @transform_2, window_bounds = array<i64: 32, 1>}, {pipeline_mode = #tpu.pipeline_mode<synchronous>, transform_indices = @transform_3, window_bounds = array<i64: 32, 1>}, {pipeline_mode = #tpu.pipeline_mode<synchronous>, transform_indices = @transform_4, window_bounds = array<i64: 1, 1>}, {transform_indices = @transform_5, window_bounds = array<i64: 1, 8>}]} {
    %c0 = arith.constant 0 : index
    %c0_0 = arith.constant 0 : index
    %0 = vector.load %arg2[%c0, %c0_0] : memref<32x3xf32, #tpu.memory_space<vmem>>, vector<32x3xf32>
    %c0_1 = arith.constant 0 : index
    %c0_2 = arith.constant 0 : index
    %1 = vector.load %arg1[%c0_1, %c0_2] : memref<3x8xf32, #tpu.memory_space<vmem>>, vector<3x8xf32>
    %cst = arith.constant dense<0.000000e+00> : vector<32x8xf32>
    %2 = tpu.matmul %0, %1, %cst {dimension_numbers = #tpu.dot_dimension_numbers<[1], [0], [0], [1], [0, 0, 1, 1], [], []>, precision = #tpu.contract_precision<fp32>} : vector<32x3xf32>, vector<3x8xf32>, vector<32x8xf32> -> vector<32x8xf32>
    %c0_3 = arith.constant 0 : index
    %c0_4 = arith.constant 0 : index
    %3 = vector.load %arg3[%c0_3, %c0_4] : memref<32x1xf32, #tpu.memory_space<vmem>>, vector<32x1xf32>
    %4 = vector.broadcast %3 : vector<32x1xf32> to vector<32x8xf32>
    %5 = arith.addf %2, %4 : vector<32x8xf32>
    %cst_5 = arith.constant 0.000000e+00 : f32
    %6 = vector.broadcast %cst_5 : f32 to vector<32x8xf32>
    %7 = arith.maximumf %5, %6 : vector<32x8xf32>
    %c0_6 = arith.constant 0 : index
    %c0_7 = arith.constant 0 : index
    %8 = vector.load %arg4[%c0_6, %c0_7] : memref<32x1xf32, #tpu.memory_space<vmem>>, vector<32x1xf32>
    %9 = vector.broadcast %8 : vector<32x1xf32> to vector<32x8xf32>
    %10 = arith.mulf %7, %9 : vector<32x8xf32>
    %cst_8 = arith.constant dense<0.000000e+00> : vector<8xf32>
    %11 = vector.multi_reduction <add>, %10, %cst_8 [0] : vector<32x8xf32> to vector<8xf32>
    %12 = vector.shape_cast %11 : vector<8xf32> to vector<1x8xf32>
    %c0_9 = arith.constant 0 : index
    %c0_10 = arith.constant 0 : index
    %13 = vector.load %arg5[%c0_9, %c0_10] : memref<1x1xf32, #tpu.memory_space<vmem>>, vector<1x1xf32>
    %14 = vector.broadcast %13 : vector<1x1xf32> to vector<1x8xf32>
    %15 = arith.addf %12, %14 : vector<1x8xf32>
    %c0_11 = arith.constant 0 : index
    %c0_12 = arith.constant 0 : index
    %16 = vector.load %arg6[%c0_11, %c0_12] : memref<1x8xf32, #tpu.memory_space<vmem>>, vector<1x8xf32>
    tpu.vector_store %arg6[%c0_11, %c0_12], %15 {strides = array<i32>} : memref<1x8xf32, #tpu.memory_space<vmem>>, vector<1x8xf32>,
    return
  }
  func.func @transform_0(%arg0: i32) -> (i32, i32) {
    %c0_i32 = arith.constant 0 : i32
    %c0_i32_0 = arith.constant 0 : i32
    return %c0_i32, %arg0 : i32, i32
  }
  func.func @transform_1(%arg0: i32) -> (i32, i32) {
    %c0_i32 = arith.constant 0 : i32
    %c0_i32_0 = arith.constant 0 : i32
    %c0_i32_1 = arith.constant 0 : i32
    return %c0_i32, %c0_i32_0 : i32, i32
  }
  func.func @transform_2(%arg0: i32) -> (i32, i32) {
    %c0_i32 = arith.constant 0 : i32
    %c0_i32_0 = arith.constant 0 : i32
    %c0_i32_1 = arith.constant 0 : i32
    return %c0_i32, %c0_i32_0 : i32, i32
  }
  func.func @transform_3(%arg0: i32) -> (i32, i32) {
    %c0_i32 = arith.constant 0 : i32
    %c0_i32_0 = arith.constant 0 : i32
    %c0_i32_1 = arith.constant 0 : i32
    return %c0_i32, %c0_i32_0 : i32, i32
  }
  func.func @transform_4(%arg0: i32) -> (i32, i32) {
    %c0_i32 = arith.constant 0 : i32
    %c0_i32_0 = arith.constant 0 : i32
    %c0_i32_1 = arith.constant 0 : i32
    return %c0_i32, %c0_i32_0 : i32, i32
  }
  func.func @transform_5(%arg0: i32) -> (i32, i32) {
    %c0_i32 = arith.constant 0 : i32
    %c0_i32_0 = arith.constant 0 : i32
    return %c0_i32, %arg0 : i32, i32
  }
}

</mosaic_0001>

<bundles_post_ra>
// kernel: tpu_custom_call.1
= control target key start
LH: loop header
LB: loop body
LE: loop exit
PB: predicated region body
PF: predicated region fallthrough
CT: control target
= control target key end

     0   :  { %s984_s0 = inlined_call_operand.vmem [shape: f32[3,8], index: 0, kind: input, shape index: {}]   ;;  %s985_s1 = inlined_call_operand.vmem [shape: f32[32,3], index: 1, kind: input, shape index: {}]   ;;  %s986_s2 = inlined_call_operand.vmem [shape: f32[32,1], index: 2, kind: input, shape index: {}]   ;;  %s987_s3 = inlined_call_operand.vmem [shape: f32[32,1], index: 3, kind: input, shape index: {}]   ;;  %s988_s4 = inlined_call_operand.<no memory space> [shape: f32[1,1], index: 4, kind: input, shape index: {}]   ;;  %s989_s5 = inlined_call_operand.hbm [shape: f32[1,8], index: 5, kind: output, shape index: {}]  }
   0x1   :  { %v10_v0 = vstv %s988_s4 }
   0x2   :  { %11 = vst [vmem:[#allocation2] sm:$0x1] %v10_v0 }
   0x3   :  { %v27_v1 = vld [vmem:[%s984_s0] sm:$0x7]  ;;  %vm65_vm0 = vcmask 1042432   ;;  %vm52_vm1 = vcmask 23552   ;;  %v24_v3 = vld [vmem:[%s985_s1 + $0x8] sm:$0xff]  ;;  %v25_v7 = vld [vmem:[%s985_s1 + $0x10] sm:$0xff] }
   0x4   :  { %v23_v2 = vld [vmem:[%s985_s1] sm:$0xff]  ;;  %v67_v4 = vsel %vm65_vm0, %v27_v1, 0  ;;  %v57_v6 = vsel %vm52_vm1, %v24_v3, 0  ;;  %v26_v8 = vld [vmem:[%s985_s1 + $0x18] sm:$0xff]  ;;  %v60_v12 = vsel %vm52_vm1, %v25_v7, 0  ;;  %v847_v13 = vmov 0  }
   0x5   :  { %v54_v5 = vsel %vm52_vm1, %v23_v2, 0  ;;  %v899_v9 = vand.u32 4294901760, %v67_v4  ;;  %v903_v11 = vand.u32 4294901760, %v57_v6  ;;  %821 = vset.pattern.permute.xlu0 %v847_v13  ;;  %v28_v14 = vld [vmem:[%s986_s2] sm:$0xff]  ;;  %822 = vset.pattern.permute.xlu1 %v847_v13  ;;  %v909_v15 = vand.u32 4294901760, %v60_v12  ;;  %v30_v17 = vld [vmem:[%s986_s2 + $0x10] sm:$0xff] }
   0x6   :  { %v901_v10 = vand.u32 4294901760, %v54_v5  ;;  %v63_v16 = vsel %vm52_vm1, %v26_v8, 0  ;;  %34 = vperm.xlu0 %821, %v28_v14   ;;  %v29_v22 = vld [vmem:[%s986_s2 + $0x8] sm:$0xff] }
   0x7   :  { %771 = vmatprep.subr.mxu0 %v899_v9  ;;  %v920_v19 = vsub.f32 %v57_v6, %v903_v11  ;;  %747 = vmatprep.subr.mxu1 %v899_v9  ;;  %v177_v20 = vsub.f32 %v67_v4, %v899_v9  ;;  %v924_v21 = vand.u32 4294901760, %v63_v16  ;;  %v156_v23 = vsub.f32 %v60_v12, %v909_v15 }
   0x8   :  { %v917_v18 = vsub.f32 %v54_v5, %v901_v10  ;;  %772 = vmatpush3.msra.mxu0 %v899_v9  ;;  %748 = vmatpush3.msra.mxu1 %v899_v9 }
   0x9   :  { %12 = vsyncpa [#allocation4], 0  ;;  %v147_v25 = vand.u32 4294901760, %v920_v19  ;;  %v178_v26 = vand.u32 4294901760, %v177_v20  ;;  %v166_v27 = vsub.f32 %v63_v16, %v924_v21  ;;  %44 = vperm.xlu1 %822, %v30_v17   ;;  %v157_v28 = vand.u32 4294901760, %v156_v23  ;;  %v648_v33 = vld [vmem:[%s987_s3] sm:$0xff] }
   0xa   :  { %v137_v24 = vand.u32 4294901760, %v917_v18  ;;  %39 = vperm.xlu0 %821, %v29_v22   ;;  %v31_v41 = vld [vmem:[%s986_s2 + $0x18] sm:$0xff]  ;;  %v650_v42 = vld [vmem:[%s987_s3 + $0x10] sm:$0xff]  ;;  %v649_v43 = vld [vmem:[%s987_s3 + $0x8] sm:$0xff]  ;;  %vm676_vm2 = vcmask 64512   ;;  %vm701_vm3 = vcmask 57344  }
   0xb   :  { %v179_v30 = vsub.f32 %v177_v20, %v178_v26  ;;  %v148_v31 = vsub.f32 %v920_v19, %v147_v25  ;;  %v167_v32 = vand.u32 4294901760, %v166_v27  ;;  %779 = vmatprep.subr.mxu0 %v178_v26  ;;  %v158_v34 = vsub.f32 %v156_v23, %v157_v28  ;;  %v690_v44 = vld [vmem:[#allocation2] sm:$0x1]  ;;  %v651_v45 = vld [vmem:[%s987_s3 + $0x18] sm:$0xff]  ;;  %s848_s3 = smov [#allocation3]  }
   0xc   :  { %773 = vmatprep.mubr.f32.mxu0 %v137_v24  ;;  %v138_v29 = vsub.f32 %v917_v18, %v137_v24  ;;  %s709_s17 = sshll.u32 %s848_s3, 4  ;;  %s710_s17 = int_to_ptr.vmem [resolvable:$true] %s709_s17 }
   0xd   :  { %774 = vmatmul.mubr.f32.vlgmr.msra.gmra.mrb[0].mxu0 %v147_v25  ;;  %v180_v36 = vand.u32 4294901760, %v179_v30  ;;  %v149_v37 = vand.u32 4294901760, %v148_v31  ;;  %v168_v38 = vsub.f32 %v166_v27, %v167_v32  ;;  %v159_v39 = vand.u32 4294901760, %v158_v34  ;;  %49 = vperm.xlu1 %822, %v31_v41   ;;  %s823_s18 = scalar_lea.vmem %s710_s17, 16  ;;  %s827_s19 = scalar_lea.vmem %s710_s17, 32 }
   0xe   :  { %v139_v35 = vand.u32 4294901760, %v138_v29  ;;  %776 = vmatprep.mubr.f32.mxu0 %v157_v28  ;;  %780 = vmatpush3.msra.mxu0 %v178_v26  ;;  %p824_p0 = scmp.ne.s32.totalorder %s710_s17, %s823_s18  ;;  %p828_p1 = scmp.lt.s32.totalorder %s710_s17, %s710_s17 }
   0xf   :  { %787 = vmatprep.subr.mxu0 %v899_v9  ;;  %654 = vperm.xlu0 %821, %v648_v33   ;;  %v169_v40 = vand.u32 4294901760, %v168_v38  ;;  %p829_p2 = scmp.lt.s32.totalorder %s827_s19, %s823_s18 }
  0x10   :  { %749 = vmatprep.mubr.f32.mxu1 %v139_v35  ;;  %755 = vmatprep.subr.mxu1 %v180_v36 }
  0x11   :  { %750 = vmatmul.mubr.f32.vlgmr.msra.gmra.mrb[0].mxu1 %v149_v37  ;;  %777 = vmatmul.mubr.f32.gmra.mrb[2].mxu0 %v167_v32  ;;  %p830_p3 = por %p829_p2, %p828_p1 }
  0x12   :  { %756 = vmatpush3.msra.mxu1 %v180_v36  ;;  %752 = vmatprep.mubr.f32.mxu1 %v159_v39 }
  0x13   :  { %781 = vmatprep.mubr.f32.mxu0 %v901_v10  ;;  %763 = vmatprep.subr.mxu1 %v177_v20  ;;  %p831_p4 = pnand %p830_p3, %p824_p0 }
  0x14   :  { %664 = vperm.xlu0 %821, %v650_v42   ;;  %659 = vperm.xlu1 %822, %v649_v43  }
  0x15   :  { %753 = vmatmul.mubr.f32.gmra.mrb[2].mxu1 %v169_v40  ;;  %782 = vmatmul.mubr.f32.vlgmr.msra.gmra.mrb[0].mxu0 %v903_v11 }
  0x16   :  { %757 = vmatprep.mubr.f32.mxu1 %v901_v10  ;;  %784 = vmatprep.mubr.f32.mxu0 %v909_v15 }
  0x17   :  { %788 = vmatpush3.msra.mxu0 %v899_v9 }
  0x18   :  { %693 = vperm.xlu0 %821, %v690_v44   ;;  %669 = vperm.xlu1 %822, %v651_v45  }
  0x19   :  { %758 = vmatmul.mubr.f32.vlgmr.msra.gmra.mrb[0].mxu1 %v903_v11  ;;  %785 = vmatmul.mubr.f32.gmra.mrb[2].mxu0 %v924_v21 }
  0x1a   :  { %764 = vmatpush3.msra.mxu1 %v177_v20  ;;  %760 = vmatprep.mubr.f32.mxu1 %v909_v15  ;;  %v696_v20 = vlaneseq }
  0x1b   :  { %789 = vmatprep.mubr.f32.mxu0 %v901_v10 }
  0x1d   :  { %761 = vmatmul.mubr.f32.gmra.mrb[2].mxu1 %v924_v21  ;;  %790 = vmatmul.mubr.f32.vlgmr.msra.gmra.mrb[0].mxu0 %v903_v11 }
  0x1e   :  { %765 = vmatprep.mubr.f32.mxu1 %v917_v18  ;;  %792 = vmatprep.mubr.f32.mxu0 %v909_v15 }
  0x21   :  { %766 = vmatmul.mubr.f32.vlgmr.msra.gmra.mrb[0].mxu1 %v920_v19  ;;  %793 = vmatmul.mubr.f32.gmra.mrb[2].mxu0 %v924_v21 }
  0x22   :  { %768 = vmatprep.mubr.f32.mxu1 %v156_v23  ;;  %v697_v23 = vshrl.u32 %v696_v20, 7 }
  0x24   :  { %v698_v26 = vsub.s32 0, %v697_v23 }
  0x25   :  { %769 = vmatmul.mubr.f32.gmra.mrb[2].mxu1 %v166_v27 }
  0x85   :  { %v35_v46 = vpop.permute.xlu0 %34 }
  0x88   :  { %v45_v47 = vpop.permute.xlu1 %44 }
  0x89   :  { %v40_v50 = vpop.permute.xlu0 %39 }
  0x8c   :  { %v50_v51 = vpop.permute.xlu1 %49 }
  0x8e   :  { %v655_v59 = vpop.permute.xlu0 %654 }
  0x93   :  { %v660_v62 = vpop.permute.xlu1 %659  ;;  %v665_v12 = vpop.permute.xlu0 %664 }
  0x97   :  { %v670_v13 = vpop.permute.xlu1 %669  ;;  %v694_v28 = vpop.permute.xlu0 %693 }
  0x98   :  { %v699_v30 = vrot.slane %v694_v28, %v698_v26 }
  0xf0   :  { %v791_v48 = vpop.f32.mrb[0].mxu0 }
  0xf1   :  { %v622_v49 = vpop.f32.mrb[1].mxu0 }
  0xf4   :  { %v767_v52 = vpop.f32.mrb[0].mxu1  ;;  %v794_v53 = vpop.f32.mrb[2].mxu0 }
  0xf5   :  { %v795_v54 = vadd.f32 %v767_v52, %v40_v50  ;;  %v339_v55 = vpop.f32.mrb[1].mxu1  ;;  %v634_v56 = vpop.f32.mrb[3].mxu0 }
  0xf6   :  { %v797_v57 = vadd.f32 %v339_v55, %v35_v46 }
  0xf7   :  { %v796_v58 = vadd.f32 %v795_v54, %v791_v48 }
  0xf8   :  { %v798_v60 = vadd.f32 %v797_v57, %v622_v49  ;;  %v770_v61 = vpop.f32.mrb[2].mxu1 }
  0xf9   :  { %v645_v63 = vmax.f32 %v796_v58, 0.0  ;;  %v799_v0 = vadd.f32 %v770_v61, %v50_v51  ;;  %v353_v1 = vpop.f32.mrb[3].mxu1 }
  0xfa   :  { %v644_v2 = vmax.f32 %v798_v60, 0.0  ;;  %v801_v3 = vadd.f32 %v353_v1, %v45_v47 }
  0xfb   :  { %v673_v4 = vmul.f32 %v660_v62, %v645_v63  ;;  %v800_v5 = vadd.f32 %v799_v0, %v794_v53 }
  0xfc   :  { %v672_v6 = vmul.f32 %v655_v59, %v644_v2  ;;  %v802_v7 = vadd.f32 %v801_v3, %v634_v56 }
  0xfd   :  { %v678_v8 = vsel %vm676_vm2, %v673_v4, 0.0  ;;  %v647_v9 = vmax.f32 %v800_v5, 0.0 }
  0xfe   :  { %v677_v10 = vsel %vm676_vm2, %v672_v6, 0.0  ;;  %v646_v11 = vmax.f32 %v802_v7, 0.0 }
  0xff   :  { %v679_v14 = vadd.f32 %v678_v8, %v677_v10  ;;  %v675_v15 = vmul.f32 %v670_v13, %v647_v9 }
 0x100   :  { %v674_v16 = vmul.f32 %v665_v12, %v646_v11 }
 0x101   :  { %v682_v19 = vsel %vm676_vm2, %v675_v15, 0.0 }
 0x102   :  { %v680_v17 = vsel %vm676_vm2, %v674_v16, 0.0 }
 0x103   :  { %v681_v18 = vadd.f32 %v680_v17, %v679_v14 }
 0x105   :  { %v683_v21 = vadd.f32 %v682_v19, %v681_v18 }
 0x107   :  { %v684_v22 = vrot.slane %v683_v21, 4 }
 0x109   :  { %v685_v24 = vadd.f32 %v684_v22, %v683_v21 }
 0x10b   :  { %v686_v25 = vrot.slane %v685_v24, 2 }
 0x10d   :  { %v687_v27 = vadd.f32 %v686_v25, %v685_v24 }
 0x10f   :  { %v688_v29 = vrot.slane %v687_v27, 1 }
 0x111   :  { %v689_v31 = vadd.f32 %v688_v29, %v687_v27 }
 0x113   :  { %v700_v32 = vadd.f32 %v699_v30, %v689_v31 }
 0x115   :  { %702 = vst.msk [vmem:[#allocation3] sm:$0x1] %vm701_vm3, %v700_v32 }
 0x116   :  { %834 = shalt.err (!%p831_p4)
}
 0x117   :  { %s835_s22 = scalar_lea.hbm %s989_s5, 16 }
 0x118   :  { %p836_p5 = scmp.ne.s32.totalorder %s989_s5, %s835_s22  ;;  %p839_p6 = scmp.lt.u32.totalorder %s835_s22, %s989_s5 }
 0x11a   :  { %p841_p7 = pnand %p839_p6, %p836_p5 }
 0x11c   :  { %844 = shalt.err (!%p841_p7)
}
 0x11d   :  { %712 = dma.vmem_to_hbm [thread:$0]  %s710_s17, 16, %s989_s5, [#allocation4]  }
 0x11e   :  { %845 = dma.done.wait [#allocation4], 16  }
 0x11f   :  { %846 = vsyncadd [#allocation4], 4294967280 }
 0x120   :  { %716 = vsyncpa [#allocation4], 1 }

</bundles_post_ra>
